<compile_context>
chip_gen: v7x
topology: tpu7x:2x2x1
jax: 0.10.0
libtpu: 0.0.40
codegen_flags: <defaults>
</compile_context>

<pallas_src>
import functools

import jax
import jax.numpy as jnp
from jax.experimental import pallas as pl
from jax.experimental.pallas import tpu as pltpu

EPS = 1e-5


def _vmem_spec():
    # Everything here is tiny -> keep every operand fully resident in VMEM.
    return pl.BlockSpec(memory_space=pltpu.MemorySpace.VMEM)


def _up8(n):
    return ((n + 7) // 8) * 8


def _slab_layout(D, H, n_hidden):
    """Per-block row layout of the packed parameter slab (all rows have width 2H).

    Section 'first' : rows [0, D) = concat([Ws0, Wt0], 1)      row D   = concat([bs0, bt0], 1)
    Section 'hid i' : rows [0,2H) = blockdiag(Ws_i, Wt_i)       row 2H  = concat([bs_i, bt_i], 1)
    Section 'last'  : rows [0, D) = concat([WsL.T, WtL.T], 1)
                      row D = bs_last, D+1 = bt_last, D+2 = log_gamma, D+3 = beta  (lane-padded)
    Every section start is 8-row aligned so all in-kernel loads are sublane-aligned.
    """
    offs = {"hid": []}
    r = 0
    offs["first"] = r
    r += _up8(D + 1)
    for _ in range(n_hidden):
        offs["hid"].append(r)
        r += _up8(2 * H + 1)
    offs["last"] = r
    r += _up8(D + 4)
    return offs, r


# ----------------------------- fused flow kernel ------------------------------

def _fused_flow_kernel(n_blocks, n_hidden, H, D, masks, x_ref, slab_ref, out_ref):
    """One kernel for the whole flow: all coupling + batchnorm stages + log-det sum.

    Inputs : x_ref (B, D), slab_ref (n_blocks * rows_per_block, 2H) packed params.
    Output : out_ref (B, (2*n_blocks + 1) * D) = [u_0 | y_0 | u_1 | y_1 | ... | sum_log_det].
    """
    two_h = 2 * H
    offs, rows_per_block = _slab_layout(D, H, n_hidden)

    x = x_ref[...]                                   # (B, D) f32, resident in VMEM
    B = x.shape[0]
    sum_ld = jnp.zeros_like(x)

    # Static lane mask selecting the s-net half of the concatenated activations.
    lane_is_s = jax.lax.broadcasted_iota(jnp.int32, (1, two_h), 1) < H

    def act_cat(h):
        # tanh on the s-net half, ReLU on the t-net half. jnp.where avoids sub-vreg
        # lane slicing; at 2H=64 the doubled EUP work is negligible.
        return jnp.where(lane_is_s, jnp.tanh(h), jnp.maximum(h, 0.0))

    out_cols = []
    for blk in range(n_blocks):
        base = blk * rows_per_block
        mask = masks[blk]                            # compile-time tuple of 0.0/1.0

        # ---- coupling: first linear (K=D) on the VPU; statically skip masked-out cols.
        o = base + offs["first"]
        first = slab_ref[o:o + D + 1, :]             # (D+1, 2H): rows 0..D-1 = W0, row D = b0
        h = jnp.broadcast_to(first[D:D + 1, :], (B, two_h))
        for d in range(D):
            if mask[d] != 0.0:                       # mx = x*mask -> only these contribute
                h = h + x[:, d:d + 1] * first[d:d + 1, :]

        # ---- hidden layers: one block-diagonal matmul of width 2H per layer (MXU).
        for i in range(n_hidden):
            o = base + offs["hid"][i]
            wi = slab_ref[o:o + two_h, :]                      # (2H, 2H)
            bi = slab_ref[o + two_h:o + two_h + 1, :]          # (1, 2H)
            h = jnp.dot(act_cat(h), wi, preferred_element_type=jnp.float32) + bi

        a = act_cat(h)
        a_s, a_t = a[:, :H], a[:, H:]

        # ---- last linear (N=D) + affine coupling: only statically-unmasked columns of
        #      s/t matter; compute them as elementwise multiply + lane reduce (no MXU).
        o = base + offs["last"]
        last = slab_ref[o:o + D + 4, :]              # (D+4, 2H)
        wlast = last[:D, :]                          # (D, 2H) = [WsL.T | WtL.T]
        bs_l, bt_l = last[D:D + 1, :], last[D + 1:D + 2, :]
        lg, beta = last[D + 2:D + 3, :D], last[D + 3:D + 4, :D]

        u_cols, ld_cols = [], []
        for d in range(D):
            if mask[d] != 0.0:
                u_cols.append(x[:, d:d + 1])                          # pass-through
                ld_cols.append(jnp.zeros((B, 1), jnp.float32))
            else:
                s_d = (jnp.sum(a_s * wlast[d:d + 1, :H], axis=-1, keepdims=True)
                       + bs_l[:, d:d + 1])
                t_d = (jnp.sum(a_t * wlast[d:d + 1, H:], axis=-1, keepdims=True)
                       + bt_l[:, d:d + 1])
                u_cols.append((x[:, d:d + 1] - t_d) * jnp.exp(-s_d))
                ld_cols.append(-s_d)
        u = jnp.concatenate(u_cols, axis=-1)         # (B, D)
        ld = jnp.concatenate(ld_cols, axis=-1)       # (B, D)

        sum_ld = sum_ld + ld
        out_cols.append(u)
        x = u

        # ---- BatchNormFlow (training-mode batch statistics, unbiased variance).
        mean = jnp.mean(x, axis=0, keepdims=True)                        # (1, D)
        var = jnp.sum((x - mean) ** 2, axis=0, keepdims=True) / (B - 1)  # torch.var(0)
        inv_std = jax.lax.rsqrt(var + EPS)
        y = jnp.exp(lg) * (x - mean) * inv_std + beta
        sum_ld = sum_ld + (lg - 0.5 * jnp.log(var + EPS))                # broadcast add
        out_cols.append(y)
        x = y

    out_cols.append(sum_ld)
    # Single lane-concatenated store at the very end (one vst instead of 2*n_blocks+1).
    out_ref[...] = jnp.concatenate(out_cols, axis=-1)


@functools.partial(jax.jit,
                   static_argnames=("n_blocks", "n_hidden", "hidden_size", "masks"))
def realnvp_forward(x, param_slab, *, n_blocks, n_hidden, hidden_size, masks):
    B, D = x.shape
    n_stages = 2 * n_blocks
    kernel = functools.partial(_fused_flow_kernel, n_blocks, n_hidden,
                               hidden_size, D, masks)
    out = pl.pallas_call(
        kernel,
        out_shape=jax.ShapeDtypeStruct((B, (n_stages + 1) * D), jnp.float32),
        in_specs=[_vmem_spec(), _vmem_spec()],
        out_specs=_vmem_spec(),
    )(x, param_slab)
    zs = jnp.stack([out[:, k * D:(k + 1) * D] for k in range(n_stages)], axis=0)
    sum_ld = out[:, n_stages * D:]
    return zs, sum_ld
    # TODO(synk): for many blocks, move the block loop onto an "arbitrary" grid axis over
    # the stacked param slab (BlockSpec row index_map, x/sum_ld carried in VMEM scratch)
    # to bound vreg live ranges and get double-buffered weight prefetch for free.
    # TODO(synk): for large batch on v7x, add a leading parallel batch grid axis plus a
    # two-pass cross-core batchnorm reduction; budget tiles against 64 MiB VMEM
    # (pltpu.CompilerParams(vmem_limit_bytes=...)).


# ------------------------------- param packing ---------------------------------

def _init_linear(key, fan_in, fan_out):
    # Deterministic synthetic init (PyTorch-Linear-like uniform(-1/sqrt(fan_in), +)).
    kw, kb = jax.random.split(key)
    bound = 1.0 / float(fan_in) ** 0.5
    w = jax.random.uniform(kw, (fan_in, fan_out), jnp.float32, -bound, bound)
    b = jax.random.uniform(kb, (1, fan_out), jnp.float32, -bound, bound)
    return w, b


def _block_diag(a, b):
    z_ab = jnp.zeros((a.shape[0], b.shape[1]), a.dtype)
    z_ba = jnp.zeros((b.shape[0], a.shape[1]), a.dtype)
    return jnp.concatenate(
        [jnp.concatenate([a, z_ab], axis=1),
         jnp.concatenate([z_ba, b], axis=1)], axis=0)


def _pack_block_slab(s_params, t_params, log_gamma, beta, D, H, n_hidden):
    """Pack one coupling block (+its batchnorm) into the (rows_per_block, 2H) slab layout."""
    two_h = 2 * H
    offs, rows_per_block = _slab_layout(D, H, n_hidden)

    def pad_rows(sec, height):
        return jnp.pad(sec, ((0, height - sec.shape[0]), (0, 0)))

    def pad_lanes(v):
        return jnp.pad(v, ((0, 0), (0, two_h - v.shape[1])))

    secs = []
    first = jnp.concatenate([
        jnp.concatenate([s_params[0], t_params[0]], axis=1),      # (D, 2H)
        jnp.concatenate([s_params[1], t_params[1]], axis=1),      # (1, 2H)
    ], axis=0)
    secs.append(pad_rows(first, _up8(D + 1)))

    for i in range(n_hidden):
        hid = jnp.concatenate([
            _block_diag(s_params[2 + 2 * i], t_params[2 + 2 * i]),            # (2H, 2H)
            jnp.concatenate([s_params[3 + 2 * i], t_params[3 + 2 * i]], 1),   # (1, 2H)
        ], axis=0)
        secs.append(pad_rows(hid, _up8(two_h + 1)))

    li = 2 + 2 * n_hidden
    last = jnp.concatenate([
        jnp.concatenate([s_params[li].T, t_params[li].T], axis=1),            # (D, 2H)
        pad_lanes(s_params[li + 1]), pad_lanes(t_params[li + 1]),
        pad_lanes(log_gamma), pad_lanes(beta),
    ], axis=0)
    secs.append(pad_rows(last, _up8(D + 4)))

    slab = jnp.concatenate(secs, axis=0)
    assert slab.shape == (rows_per_block, two_h)
    return slab


# ------------------------------- model wrapper ---------------------------------

class RealNVPPallas:
    def __init__(self, n_blocks, input_size, hidden_size, n_hidden, key):
        self.n_blocks = n_blocks
        self.n_hidden = n_hidden
        self.hidden_size = hidden_size
        self.input_size = input_size

        masks = []
        m = [float(i % 2) for i in range(input_size)]
        self.raw_blocks = []     # unpacked params (for the pure-JAX reference)
        block_slabs = []
        for _ in range(n_blocks):
            key, ks, kt = jax.random.split(key, 3)
            s_params = self._init_mlp(ks, input_size, hidden_size, n_hidden)
            t_params = self._init_mlp(kt, input_size, hidden_size, n_hidden)
            log_gamma = jnp.zeros((1, input_size), jnp.float32)   # BatchNormFlow params
            beta = jnp.zeros((1, input_size), jnp.float32)
            self.raw_blocks.append((s_params, t_params, log_gamma, beta))
            block_slabs.append(_pack_block_slab(s_params, t_params, log_gamma, beta,
                                                input_size, hidden_size, n_hidden))
            masks.append(tuple(m))
            m = [1.0 - v for v in m]
        self.masks = tuple(masks)
        # One packed parameter slab for the whole flow -> a single DMA per forward.
        self.param_slab = jnp.concatenate(block_slabs, axis=0)

    @staticmethod
    def _init_mlp(key, D, H, n_hidden):
        dims = [D] + [H] * (n_hidden + 1) + [D]    # n_hidden+2 linear layers
        params = []
        for i in range(len(dims) - 1):
            key, sub = jax.random.split(key)
            w, b = _init_linear(sub, dims[i], dims[i + 1])
            params += [w, b]
        return params

    def forward(self, x):
        """T(x) = z ; returns (list of intermediate zs, sum of log|det J|)."""
        zs_stacked, sum_ld = realnvp_forward(
            x, self.param_slab, n_blocks=self.n_blocks, n_hidden=self.n_hidden,
            hidden_size=self.hidden_size, masks=self.masks)
        zs = [x] + [zs_stacked[i] for i in range(2 * self.n_blocks)]
        return zs, sum_ld
    # TODO(synk): running_mean / running_var in-place buffer updates of BatchNormFlow
    # (training side effects) are not representable in a pure Pallas forward and are
    # omitted; the forward math uses batch statistics exactly as in training mode.

    def reference_forward(self, x):
        """Pure-JAX reference with identical semantics (for correctness check)."""
        zs = [x]
        sum_ld = jnp.zeros_like(x)
        for (s_params, t_params, log_gamma, beta), mask in zip(self.raw_blocks, self.masks):
            m = jnp.asarray(mask, jnp.float32)[None, :]
            mx = x * m

            def mlp(params, act):
                h = mx @ params[0] + params[1]
                for i in range(self.n_hidden + 1):
                    h = act(h) @ params[2 + 2 * i] + params[3 + 2 * i]
                return h

            s = mlp(s_params, jnp.tanh)
            t = mlp(t_params, lambda v: jnp.maximum(v, 0.0))
            u = mx + (1.0 - m) * (x - t) * jnp.exp(-s)
            sum_ld = sum_ld + (-(1.0 - m) * s)
            zs.append(u)
            x = u

            mean = jnp.mean(x, axis=0, keepdims=True)
            var = jnp.sum((x - mean) ** 2, axis=0, keepdims=True) / (x.shape[0] - 1)
            y = jnp.exp(log_gamma) * (x - mean) * jax.lax.rsqrt(var + EPS) + beta
            sum_ld = sum_ld + (log_gamma - 0.5 * jnp.log(var + EPS))
            zs.append(y)
            x = y
        return zs, sum_ld


# ------------------------------------ main -------------------------------------

if __name__ == "__main__":
    key = jax.random.PRNGKey(0)
    k_data, k_model = jax.random.split(key)

    B, D, H = 8, 2, 32            # source_density is a 2-D Gaussian -> input_size = 2
    n_blocks, n_hidden = 2, 1

    x = jax.random.normal(k_data, (B, D), dtype=jnp.float32)

    model = RealNVPPallas(n_blocks, D, H, n_hidden, k_model)
    zs, sum_log_abs_det_jacobians = model.forward(x)

    jax.block_until_ready(zs[-1])
    jax.block_until_ready(sum_log_abs_det_jacobians)

    zs_ref, sum_ld_ref = model.reference_forward(x)

    assert zs[-1].shape == (B, D)
    assert sum_log_abs_det_jacobians.shape == (B, D)
    assert len(zs) == 2 * n_blocks + 1
    assert bool(jnp.all(jnp.isfinite(zs[-1])))
    assert bool(jnp.all(jnp.isfinite(sum_log_abs_det_jacobians)))
    assert bool(jnp.allclose(zs[-1], zs_ref[-1], rtol=5e-3, atol=5e-3))
    assert bool(jnp.allclose(sum_log_abs_det_jacobians, sum_ld_ref, rtol=5e-3, atol=5e-3))

    print("KERNEL_OK")
</pallas_src>

<mosaic_0001>
module attributes {stable_mosaic.version = 11 : i64} {
  func.func @_fused_flow_kernel(%arg0: memref<8x2xf32, #tpu.memory_space<vmem>>, %arg1: memref<176x64xf32, #tpu.memory_space<vmem>>, %arg2: memref<8x10xf32, #tpu.memory_space<vmem>>) attributes {dimension_semantics = [], scalar_prefetch = 0 : i64, scratch_operands = 0 : i64, tpu.core_type = #tpu.core_type<tc>} {
    %c0 = arith.constant 0 : index
    %c0_0 = arith.constant 0 : index
    %0 = vector.load %arg0[%c0, %c0_0] : memref<8x2xf32, #tpu.memory_space<vmem>>, vector<8x2xf32>
    %cst = arith.constant 0.000000e+00 : f32
    %1 = vector.broadcast %cst : f32 to vector<8x2xf32>
    %2 = tpu.iota {dimensions = array<i32: 1>} : vector<1x64xi32>
    %c32_i32 = arith.constant 32 : i32
    %3 = vector.broadcast %c32_i32 : i32 to vector<1x64xi32>
    %4 = arith.cmpi slt, %2, %3 : vector<1x64xi32>
    %c0_1 = arith.constant 0 : index
    %c0_2 = arith.constant 0 : index
    %5 = vector.load %arg1[%c0_1, %c0_2] : memref<176x64xf32, #tpu.memory_space<vmem>>, vector<3x64xf32>
    %6 = vector.extract_strided_slice %5 {offsets = [2, 0], sizes = [1, 64], strides = [1, 1]} : vector<3x64xf32> to vector<1x64xf32>
    %7 = vector.shape_cast %6 : vector<1x64xf32> to vector<1x64xf32>
    %8 = vector.broadcast %7 : vector<1x64xf32> to vector<8x64xf32>
    %9 = vector.extract_strided_slice %0 {offsets = [0, 1], sizes = [8, 1], strides = [1, 1]} : vector<8x2xf32> to vector<8x1xf32>
    %10 = vector.extract_strided_slice %5 {offsets = [1, 0], sizes = [1, 64], strides = [1, 1]} : vector<3x64xf32> to vector<1x64xf32>
    %11 = vector.broadcast %9 : vector<8x1xf32> to vector<8x64xf32>
    %12 = vector.broadcast %10 : vector<1x64xf32> to vector<8x64xf32>
    %13 = arith.mulf %11, %12 : vector<8x64xf32>
    %14 = arith.addf %8, %13 : vector<8x64xf32>
    %c8 = arith.constant 8 : index
    %c0_3 = arith.constant 0 : index
    %15 = vector.load %arg1[%c8, %c0_3] : memref<176x64xf32, #tpu.memory_space<vmem>>, vector<64x64xf32>
    %c72 = arith.constant 72 : index
    %c0_4 = arith.constant 0 : index
    %16 = vector.load %arg1[%c72, %c0_4] : memref<176x64xf32, #tpu.memory_space<vmem>>, vector<1x64xf32>
    %17 = math.tanh %14 : vector<8x64xf32>
    %cst_5 = arith.constant 0.000000e+00 : f32
    %18 = vector.broadcast %cst_5 : f32 to vector<8x64xf32>
    %19 = arith.maximumf %14, %18 : vector<8x64xf32>
    %20 = vector.shape_cast %4 : vector<1x64xi1> to vector<1x64xi1>
    %21 = vector.broadcast %20 : vector<1x64xi1> to vector<8x64xi1>
    %22 = arith.select %21, %17, %19 : vector<8x64xi1>, vector<8x64xf32>
    %cst_6 = arith.constant dense<0.000000e+00> : vector<8x64xf32>
    %23 = tpu.matmul %22, %15, %cst_6 {dimension_numbers = #tpu.dot_dimension_numbers<[1], [0], [0], [1], [0, 0, 1, 1], [], []>} : vector<8x64xf32>, vector<64x64xf32>, vector<8x64xf32> -> vector<8x64xf32>
    %24 = vector.broadcast %16 : vector<1x64xf32> to vector<8x64xf32>
    %25 = arith.addf %23, %24 : vector<8x64xf32>
    %26 = math.tanh %25 : vector<8x64xf32>
    %cst_7 = arith.constant 0.000000e+00 : f32
    %27 = vector.broadcast %cst_7 : f32 to vector<8x64xf32>
    %28 = arith.maximumf %25, %27 : vector<8x64xf32>
    %29 = vector.shape_cast %4 : vector<1x64xi1> to vector<1x64xi1>
    %30 = vector.broadcast %29 : vector<1x64xi1> to vector<8x64xi1>
    %31 = arith.select %30, %26, %28 : vector<8x64xi1>, vector<8x64xf32>
    %32 = vector.extract_strided_slice %31 {offsets = [0, 0], sizes = [8, 32], strides = [1, 1]} : vector<8x64xf32> to vector<8x32xf32>
    %33 = vector.extract_strided_slice %31 {offsets = [0, 32], sizes = [8, 32], strides = [1, 1]} : vector<8x64xf32> to vector<8x32xf32>
    %c80 = arith.constant 80 : index
    %c0_8 = arith.constant 0 : index
    %34 = vector.load %arg1[%c80, %c0_8] : memref<176x64xf32, #tpu.memory_space<vmem>>, vector<6x64xf32>
    %35 = vector.extract_strided_slice %34 {offsets = [0, 0], sizes = [2, 64], strides = [1, 1]} : vector<6x64xf32> to vector<2x64xf32>
    %36 = vector.extract_strided_slice %34 {offsets = [2, 0], sizes = [1, 64], strides = [1, 1]} : vector<6x64xf32> to vector<1x64xf32>
    %37 = vector.extract_strided_slice %34 {offsets = [3, 0], sizes = [1, 64], strides = [1, 1]} : vector<6x64xf32> to vector<1x64xf32>
    %38 = vector.extract_strided_slice %34 {offsets = [4, 0], sizes = [1, 2], strides = [1, 1]} : vector<6x64xf32> to vector<1x2xf32>
    %39 = vector.extract_strided_slice %34 {offsets = [5, 0], sizes = [1, 2], strides = [1, 1]} : vector<6x64xf32> to vector<1x2xf32>
    %40 = vector.extract_strided_slice %35 {offsets = [0, 0], sizes = [1, 32], strides = [1, 1]} : vector<2x64xf32> to vector<1x32xf32>
    %41 = vector.broadcast %40 : vector<1x32xf32> to vector<8x32xf32>
    %42 = arith.mulf %32, %41 : vector<8x32xf32>
    %cst_9 = arith.constant dense<0.000000e+00> : vector<8xf32>
    %43 = vector.multi_reduction <add>, %42, %cst_9 [1] : vector<8x32xf32> to vector<8xf32>
    %44 = vector.shape_cast %43 : vector<8xf32> to vector<8x1xf32>
    %45 = vector.extract_strided_slice %36 {offsets = [0, 0], sizes = [1, 1], strides = [1, 1]} : vector<1x64xf32> to vector<1x1xf32>
    %46 = vector.broadcast %45 : vector<1x1xf32> to vector<8x1xf32>
    %47 = arith.addf %44, %46 : vector<8x1xf32>
    %48 = vector.extract_strided_slice %35 {offsets = [0, 32], sizes = [1, 32], strides = [1, 1]} : vector<2x64xf32> to vector<1x32xf32>
    %49 = vector.broadcast %48 : vector<1x32xf32> to vector<8x32xf32>
    %50 = arith.mulf %33, %49 : vector<8x32xf32>
    %cst_10 = arith.constant dense<0.000000e+00> : vector<8xf32>
    %51 = vector.multi_reduction <add>, %50, %cst_10 [1] : vector<8x32xf32> to vector<8xf32>
    %52 = vector.shape_cast %51 : vector<8xf32> to vector<8x1xf32>
    %53 = vector.extract_strided_slice %37 {offsets = [0, 0], sizes = [1, 1], strides = [1, 1]} : vector<1x64xf32> to vector<1x1xf32>
    %54 = vector.broadcast %53 : vector<1x1xf32> to vector<8x1xf32>
    %55 = arith.addf %52, %54 : vector<8x1xf32>
    %56 = vector.extract_strided_slice %0 {offsets = [0, 0], sizes = [8, 1], strides = [1, 1]} : vector<8x2xf32> to vector<8x1xf32>
    %57 = arith.subf %56, %55 : vector<8x1xf32>
    %cst_11 = arith.constant 0.000000e+00 : f32
    %58 = vector.broadcast %cst_11 : f32 to vector<8x1xf32>
    %59 = arith.subf %58, %47 : vector<8x1xf32>
    %60 = math.exp %59 : vector<8x1xf32>
    %61 = arith.mulf %57, %60 : vector<8x1xf32>
    %cst_12 = arith.constant 0.000000e+00 : f32
    %62 = vector.broadcast %cst_12 : f32 to vector<8x1xf32>
    %63 = arith.subf %62, %47 : vector<8x1xf32>
    %64 = vector.extract_strided_slice %0 {offsets = [0, 1], sizes = [8, 1], strides = [1, 1]} : vector<8x2xf32> to vector<8x1xf32>
    %cst_13 = arith.constant 0.000000e+00 : f32
    %65 = vector.broadcast %cst_13 : f32 to vector<8x1xf32>
    %66 = tpu.concatenate %61, %64 in 1 : vector<8x1xf32>, vector<8x1xf32> -> vector<8x2xf32>
    %67 = tpu.concatenate %63, %65 in 1 : vector<8x1xf32>, vector<8x1xf32> -> vector<8x2xf32>
    %68 = arith.addf %1, %67 : vector<8x2xf32>
    %cst_14 = arith.constant dense<0.000000e+00> : vector<2xf32>
    %69 = vector.multi_reduction <add>, %66, %cst_14 [0] : vector<8x2xf32> to vector<2xf32>
    %70 = vector.shape_cast %69 : vector<2xf32> to vector<1x2xf32>
    %cst_15 = arith.constant 8.000000e+00 : f32
    %71 = vector.broadcast %cst_15 : f32 to vector<1x2xf32>
    %72 = arith.divf %70, %71 : vector<1x2xf32>
    %73 = vector.broadcast %72 : vector<1x2xf32> to vector<8x2xf32>
    %74 = arith.subf %66, %73 : vector<8x2xf32>
    %75 = arith.mulf %74, %74 : vector<8x2xf32>
    %cst_16 = arith.constant dense<0.000000e+00> : vector<2xf32>
    %76 = vector.multi_reduction <add>, %75, %cst_16 [0] : vector<8x2xf32> to vector<2xf32>
    %77 = vector.shape_cast %76 : vector<2xf32> to vector<1x2xf32>
    %cst_17 = arith.constant 7.000000e+00 : f32
    %78 = vector.broadcast %cst_17 : f32 to vector<1x2xf32>
    %79 = arith.divf %77, %78 : vector<1x2xf32>
    %cst_18 = arith.constant 9.99999974E-6 : f32
    %80 = vector.broadcast %cst_18 : f32 to vector<1x2xf32>
    %81 = arith.addf %79, %80 : vector<1x2xf32>
    %82 = math.rsqrt %81 : vector<1x2xf32>
    %83 = math.exp %38 : vector<1x2xf32>
    %84 = vector.broadcast %72 : vector<1x2xf32> to vector<8x2xf32>
    %85 = arith.subf %66, %84 : vector<8x2xf32>
    %86 = vector.broadcast %83 : vector<1x2xf32> to vector<8x2xf32>
    %87 = arith.mulf %86, %85 : vector<8x2xf32>
    %88 = vector.broadcast %82 : vector<1x2xf32> to vector<8x2xf32>
    %89 = arith.mulf %87, %88 : vector<8x2xf32>
    %90 = vector.broadcast %39 : vector<1x2xf32> to vector<8x2xf32>
    %91 = arith.addf %89, %90 : vector<8x2xf32>
    %cst_19 = arith.constant 9.99999974E-6 : f32
    %92 = vector.broadcast %cst_19 : f32 to vector<1x2xf32>
    %93 = arith.addf %79, %92 : vector<1x2xf32>
    %94 = math.log %93 : vector<1x2xf32>
    %cst_20 = arith.constant 5.000000e-01 : f32
    %95 = vector.broadcast %cst_20 : f32 to vector<1x2xf32>
    %96 = arith.mulf %95, %94 : vector<1x2xf32>
    %97 = arith.subf %38, %96 : vector<1x2xf32>
    %98 = vector.broadcast %97 : vector<1x2xf32> to vector<8x2xf32>
    %99 = arith.addf %68, %98 : vector<8x2xf32>
    %c88 = arith.constant 88 : index
    %c0_21 = arith.constant 0 : index
    %100 = vector.load %arg1[%c88, %c0_21] : memref<176x64xf32, #tpu.memory_space<vmem>>, vector<3x64xf32>
    %101 = vector.extract_strided_slice %100 {offsets = [2, 0], sizes = [1, 64], strides = [1, 1]} : vector<3x64xf32> to vector<1x64xf32>
    %102 = vector.shape_cast %101 : vector<1x64xf32> to vector<1x64xf32>
    %103 = vector.broadcast %102 : vector<1x64xf32> to vector<8x64xf32>
    %104 = vector.extract_strided_slice %91 {offsets = [0, 0], sizes = [8, 1], strides = [1, 1]} : vector<8x2xf32> to vector<8x1xf32>
    %105 = vector.extract_strided_slice %100 {offsets = [0, 0], sizes = [1, 64], strides = [1, 1]} : vector<3x64xf32> to vector<1x64xf32>
    %106 = vector.broadcast %104 : vector<8x1xf32> to vector<8x64xf32>
    %107 = vector.broadcast %105 : vector<1x64xf32> to vector<8x64xf32>
    %108 = arith.mulf %106, %107 : vector<8x64xf32>
    %109 = arith.addf %103, %108 : vector<8x64xf32>
    %c96 = arith.constant 96 : index
    %c0_22 = arith.constant 0 : index
    %110 = vector.load %arg1[%c96, %c0_22] : memref<176x64xf32, #tpu.memory_space<vmem>>, vector<64x64xf32>
    %c160 = arith.constant 160 : index
    %c0_23 = arith.constant 0 : index
    %111 = vector.load %arg1[%c160, %c0_23] : memref<176x64xf32, #tpu.memory_space<vmem>>, vector<1x64xf32>
    %112 = math.tanh %109 : vector<8x64xf32>
    %cst_24 = arith.constant 0.000000e+00 : f32
    %113 = vector.broadcast %cst_24 : f32 to vector<8x64xf32>
    %114 = arith.maximumf %109, %113 : vector<8x64xf32>
    %115 = vector.shape_cast %4 : vector<1x64xi1> to vector<1x64xi1>
    %116 = vector.broadcast %115 : vector<1x64xi1> to vector<8x64xi1>
    %117 = arith.select %116, %112, %114 : vector<8x64xi1>, vector<8x64xf32>
    %cst_25 = arith.constant dense<0.000000e+00> : vector<8x64xf32>
    %118 = tpu.matmul %117, %110, %cst_25 {dimension_numbers = #tpu.dot_dimension_numbers<[1], [0], [0], [1], [0, 0, 1, 1], [], []>} : vector<8x64xf32>, vector<64x64xf32>, vector<8x64xf32> -> vector<8x64xf32>
    %119 = vector.broadcast %111 : vector<1x64xf32> to vector<8x64xf32>
    %120 = arith.addf %118, %119 : vector<8x64xf32>
    %121 = math.tanh %120 : vector<8x64xf32>
    %cst_26 = arith.constant 0.000000e+00 : f32
    %122 = vector.broadcast %cst_26 : f32 to vector<8x64xf32>
    %123 = arith.maximumf %120, %122 : vector<8x64xf32>
    %124 = vector.shape_cast %4 : vector<1x64xi1> to vector<1x64xi1>
    %125 = vector.broadcast %124 : vector<1x64xi1> to vector<8x64xi1>
    %126 = arith.select %125, %121, %123 : vector<8x64xi1>, vector<8x64xf32>
    %127 = vector.extract_strided_slice %126 {offsets = [0, 0], sizes = [8, 32], strides = [1, 1]} : vector<8x64xf32> to vector<8x32xf32>
    %128 = vector.extract_strided_slice %126 {offsets = [0, 32], sizes = [8, 32], strides = [1, 1]} : vector<8x64xf32> to vector<8x32xf32>
    %c168 = arith.constant 168 : index
    %c0_27 = arith.constant 0 : index
    %129 = vector.load %arg1[%c168, %c0_27] : memref<176x64xf32, #tpu.memory_space<vmem>>, vector<6x64xf32>
    %130 = vector.extract_strided_slice %129 {offsets = [0, 0], sizes = [2, 64], strides = [1, 1]} : vector<6x64xf32> to vector<2x64xf32>
    %131 = vector.extract_strided_slice %129 {offsets = [2, 0], sizes = [1, 64], strides = [1, 1]} : vector<6x64xf32> to vector<1x64xf32>
    %132 = vector.extract_strided_slice %129 {offsets = [3, 0], sizes = [1, 64], strides = [1, 1]} : vector<6x64xf32> to vector<1x64xf32>
    %133 = vector.extract_strided_slice %129 {offsets = [4, 0], sizes = [1, 2], strides = [1, 1]} : vector<6x64xf32> to vector<1x2xf32>
    %134 = vector.extract_strided_slice %129 {offsets = [5, 0], sizes = [1, 2], strides = [1, 1]} : vector<6x64xf32> to vector<1x2xf32>
    %135 = vector.extract_strided_slice %91 {offsets = [0, 0], sizes = [8, 1], strides = [1, 1]} : vector<8x2xf32> to vector<8x1xf32>
    %cst_28 = arith.constant 0.000000e+00 : f32
    %136 = vector.broadcast %cst_28 : f32 to vector<8x1xf32>
    %137 = vector.extract_strided_slice %130 {offsets = [1, 0], sizes = [1, 32], strides = [1, 1]} : vector<2x64xf32> to vector<1x32xf32>
    %138 = vector.broadcast %137 : vector<1x32xf32> to vector<8x32xf32>
    %139 = arith.mulf %127, %138 : vector<8x32xf32>
    %cst_29 = arith.constant dense<0.000000e+00> : vector<8xf32>
    %140 = vector.multi_reduction <add>, %139, %cst_29 [1] : vector<8x32xf32> to vector<8xf32>
    %141 = vector.shape_cast %140 : vector<8xf32> to vector<8x1xf32>
    %142 = vector.extract_strided_slice %131 {offsets = [0, 1], sizes = [1, 1], strides = [1, 1]} : vector<1x64xf32> to vector<1x1xf32>
    %143 = vector.broadcast %142 : vector<1x1xf32> to vector<8x1xf32>
    %144 = arith.addf %141, %143 : vector<8x1xf32>
    %145 = vector.extract_strided_slice %130 {offsets = [1, 32], sizes = [1, 32], strides = [1, 1]} : vector<2x64xf32> to vector<1x32xf32>
    %146 = vector.broadcast %145 : vector<1x32xf32> to vector<8x32xf32>
    %147 = arith.mulf %128, %146 : vector<8x32xf32>
    %cst_30 = arith.constant dense<0.000000e+00> : vector<8xf32>
    %148 = vector.multi_reduction <add>, %147, %cst_30 [1] : vector<8x32xf32> to vector<8xf32>
    %149 = vector.shape_cast %148 : vector<8xf32> to vector<8x1xf32>
    %150 = vector.extract_strided_slice %132 {offsets = [0, 1], sizes = [1, 1], strides = [1, 1]} : vector<1x64xf32> to vector<1x1xf32>
    %151 = vector.broadcast %150 : vector<1x1xf32> to vector<8x1xf32>
    %152 = arith.addf %149, %151 : vector<8x1xf32>
    %153 = vector.extract_strided_slice %91 {offsets = [0, 1], sizes = [8, 1], strides = [1, 1]} : vector<8x2xf32> to vector<8x1xf32>
    %154 = arith.subf %153, %152 : vector<8x1xf32>
    %cst_31 = arith.constant 0.000000e+00 : f32
    %155 = vector.broadcast %cst_31 : f32 to vector<8x1xf32>
    %156 = arith.subf %155, %144 : vector<8x1xf32>
    %157 = math.exp %156 : vector<8x1xf32>
    %158 = arith.mulf %154, %157 : vector<8x1xf32>
    %cst_32 = arith.constant 0.000000e+00 : f32
    %159 = vector.broadcast %cst_32 : f32 to vector<8x1xf32>
    %160 = arith.subf %159, %144 : vector<8x1xf32>
    %161 = tpu.concatenate %135, %158 in 1 : vector<8x1xf32>, vector<8x1xf32> -> vector<8x2xf32>
    %162 = tpu.concatenate %136, %160 in 1 : vector<8x1xf32>, vector<8x1xf32> -> vector<8x2xf32>
    %163 = arith.addf %99, %162 : vector<8x2xf32>
    %cst_33 = arith.constant dense<0.000000e+00> : vector<2xf32>
    %164 = vector.multi_reduction <add>, %161, %cst_33 [0] : vector<8x2xf32> to vector<2xf32>
    %165 = vector.shape_cast %164 : vector<2xf32> to vector<1x2xf32>
    %cst_34 = arith.constant 8.000000e+00 : f32
    %166 = vector.broadcast %cst_34 : f32 to vector<1x2xf32>
    %167 = arith.divf %165, %166 : vector<1x2xf32>
    %168 = vector.broadcast %167 : vector<1x2xf32> to vector<8x2xf32>
    %169 = arith.subf %161, %168 : vector<8x2xf32>
    %170 = arith.mulf %169, %169 : vector<8x2xf32>
    %cst_35 = arith.constant dense<0.000000e+00> : vector<2xf32>
    %171 = vector.multi_reduction <add>, %170, %cst_35 [0] : vector<8x2xf32> to vector<2xf32>
    %172 = vector.shape_cast %171 : vector<2xf32> to vector<1x2xf32>
    %cst_36 = arith.constant 7.000000e+00 : f32
    %173 = vector.broadcast %cst_36 : f32 to vector<1x2xf32>
    %174 = arith.divf %172, %173 : vector<1x2xf32>
    %cst_37 = arith.constant 9.99999974E-6 : f32
    %175 = vector.broadcast %cst_37 : f32 to vector<1x2xf32>
    %176 = arith.addf %174, %175 : vector<1x2xf32>
    %177 = math.rsqrt %176 : vector<1x2xf32>
    %178 = math.exp %133 : vector<1x2xf32>
    %179 = vector.broadcast %167 : vector<1x2xf32> to vector<8x2xf32>
    %180 = arith.subf %161, %179 : vector<8x2xf32>
    %181 = vector.broadcast %178 : vector<1x2xf32> to vector<8x2xf32>
    %182 = arith.mulf %181, %180 : vector<8x2xf32>
    %183 = vector.broadcast %177 : vector<1x2xf32> to vector<8x2xf32>
    %184 = arith.mulf %182, %183 : vector<8x2xf32>
    %185 = vector.broadcast %134 : vector<1x2xf32> to vector<8x2xf32>
    %186 = arith.addf %184, %185 : vector<8x2xf32>
    %cst_38 = arith.constant 9.99999974E-6 : f32
    %187 = vector.broadcast %cst_38 : f32 to vector<1x2xf32>
    %188 = arith.addf %174, %187 : vector<1x2xf32>
    %189 = math.log %188 : vector<1x2xf32>
    %cst_39 = arith.constant 5.000000e-01 : f32
    %190 = vector.broadcast %cst_39 : f32 to vector<1x2xf32>
    %191 = arith.mulf %190, %189 : vector<1x2xf32>
    %192 = arith.subf %133, %191 : vector<1x2xf32>
    %193 = vector.broadcast %192 : vector<1x2xf32> to vector<8x2xf32>
    %194 = arith.addf %163, %193 : vector<8x2xf32>
    %195 = tpu.concatenate %66, %91, %161, %186, %194 in 1 : vector<8x2xf32>, vector<8x2xf32>, vector<8x2xf32>, vector<8x2xf32>, vector<8x2xf32> -> vector<8x10xf32>
    %c0_40 = arith.constant 0 : index
    %c0_41 = arith.constant 0 : index
    %196 = vector.load %arg2[%c0_40, %c0_41] : memref<8x10xf32, #tpu.memory_space<vmem>>, vector<8x10xf32>
    tpu.vector_store %arg2[%c0_40, %c0_41], %195 {strides = array<i32>} : memref<8x10xf32, #tpu.memory_space<vmem>>, vector<8x10xf32>,
    return
  }
}

</mosaic_0001>

<bundles_post_ra>
// kernel: realnvp_forward.1
= control target key start
LH: loop header
LB: loop body
LE: loop exit
PB: predicated region body
PF: predicated region fallthrough
CT: control target
= control target key end

     0   :  { %v539_v0 = vmov 1   ;;  %v540_v3 = vmov 0.0|0.0   ;;  %vm541_vm0 = vmmov 0   ;;  %v542_v11 = vmov 0.0   ;;  %s543_s4 = smov 96   ;;  %s545_s26 = smov 2   ;;  %s740_s0 = inlined_call_operand.vmem [shape: f32[8,2], index: 0, kind: input, shape index: {}]   ;;  %s741_s1 = inlined_call_operand.vmem [shape: f32[176,64], index: 1, kind: input, shape index: {}]   ;;  %s742_s2 = inlined_call_operand.vmem [shape: f32[8,10], index: 2, kind: output, shape index: {}]  }
   0x1   :  { %513 = vset.pattern.permute.xlu0 %v539_v0  ;;  %v567_v1 = vld [vmem:[%s740_s0] sm:$0xff]  ;;  %v31_v2 = vld [vmem:[%s741_s1 + $0x8] sm:$0xff]  ;;  %479 = vmatprep.subr.bf16.mxu0 %v540_v3  ;;  %v32_v4 = vld [vmem:[%s741_s1 + $0x10] sm:$0xff]  ;;  %v12_v16 = vlaneseq  ;;  %vm49_vm2 = vcmask 523264   ;;  %vm132_vm3 = vcmask 261120   ;;  %v544_v44 = vmov 0  }
   0x2   :  { %22 = vperm.xlu0 %513, %v567_v1   ;;  %v480_v5 = vpack.c.bf16 %v32_v4, %v31_v2  ;;  %491 = vmatprep.subr.bf16.mxu1 %v540_v3  ;;  %v33_v6 = vld [vmem:[%s741_s1 + $0x18] sm:$0xff]  ;;  %v34_v7 = vld [vmem:[%s741_s1 + $0x20] sm:$0xff]  ;;  %v35_v9 = vld [vmem:[%s741_s1 + $0x28] sm:$0xff]  ;;  %vm162_vm4 = vcmask 15360   ;;  %vm158_vm5 = vcmask 7168   ;;  %s547_s27 = smov 6  }
   0x3   :  { %v483_v8 = vpack.c.bf16 %v34_v7, %v33_v6  ;;  %v36_v10 = vld [vmem:[%s741_s1 + $0x30] sm:$0xff]  ;;  %457 = vmatprep.mubr.msk.f32.mxu0 %vm541_vm0, %v542_v11  ;;  %476 = vmatprep.mubr.msk.f32.mxu1 %vm541_vm0, %v542_v11  ;;  %v37_v13 = vld [vmem:[%s741_s1 + $0x38] sm:$0xff]  ;;  %v38_v14 = vld [vmem:[%s741_s1 + $0x40] sm:$0xff]  ;;  %v599_v17 = vshrl.u32 %v12_v16, 7  ;;  %v611_v26 = vand.u32 127, %v12_v16  ;;  %s548_s28 = smov 8  }
   0x4   :  { %481 = vmatpush3.bf16.msra.mxu0 %v480_v5  ;;  %v486_v12 = vpack.c.bf16 %v36_v10, %v35_v9  ;;  %v489_v15 = vpack.c.bf16 %v38_v14, %v37_v13  ;;  %v15_v19 = vld [vmem:[%s741_s1] sm:$0x7]  ;;  %v419_v30 = vld [vmem:[%s741_s1 + $0x48] ss:$0 sm:$0xff]  ;;  %v624_v35 = vld [vmem:[%s741_s1 + $0x50] sm:$0x3f] }
   0x5   :  { %482 = vmatprep.subr.bf16.mxu0 %v540_v3  ;;  %v27_v18 = vsub.s32 1, %v599_v17  ;;  %v606_v20 = vsub.s32 2, %v599_v17  ;;  %vm14_vm1 = vcmp.lt.s32.totalorder %v611_v26, 32  ;;  %v129_v34 = vsub.s32 0, %v599_v17 }
   0x6   :  { %514 = vset.pattern.permute.xlu0 %v544_v44  ;;  %v150_v50 = vsub.s32 3, %v599_v17  ;;  %vm407_vm6 = vcmask 31744   ;;  %vm409_vm7 = vcmask 48128   ;;  %vm411_vm8 = vcmask 64512  }
   0x7   :  { %v28_v21 = vrot.slane %v15_v19, %v27_v18  ;;  %v19_v22 = vrot.slane %v15_v19, %v606_v20  ;;  %v130_v36 = vrot.slane %v624_v35, %v129_v34  ;;  %v139_v45 = vrot.slane %v624_v35, %v606_v20 }
   0x8   :  { %484 = vmatpush3.bf16.msra.mxu0 %v483_v8  ;;  %v151_v51 = vrot.slane %v624_v35, %v150_v50  ;;  %vm413_vm9 = vcmask 80896  }
   0x9   :  { %485 = vmatprep.subr.bf16.mxu0 %v540_v3 }
   0xc   :  { %487 = vmatpush3.bf16.msra.mxu0 %v486_v12 }
   0xd   :  { %488 = vmatprep.subr.bf16.mxu0 %v540_v3 }
  0x10   :  { %490 = vmatpush3.bf16.msra.mxu0 %v489_v15  ;;  %v651_v15 = vsub.s32 4, %v599_v17 }
  0x81   :  { %v23_v23 = vpop.permute.xlu0 %22 }
  0x82   :  { %v29_v24 = vmul.f32 %v28_v21, %v23_v23  ;;  %v195_v21 = vsub.s32 5, %v599_v17 }
  0x84   :  { %v30_v25 = vadd.f32 %v29_v24, %v19_v22  ;;  %v196_v23 = vrot.slane %v624_v35, %v195_v21 }
  0x86   :  { %515 = vtanh.f32 %v30_v25  ;;  %v41_v27 = vmax.f32 %v30_v25, 0.0 }
  0x90   :  { %v516_v28 = vpop.eup %515 }
  0x91   :  { %v44_v29 = vsel %vm14_vm1, %v516_v28, %v41_v27 }
  0x92   :  { %458 = vmatmul.mubr.msk.f32.vlgmr.msra.gmra.mrb[0].mxu0 %vm49_vm2, %v44_v29 }
 0x165   :  { %v119_v31 = vpop.f32.mrb[0].mxu0 }
 0x166   :  { %v120_v32 = vadd.f32 %v419_v30, %v119_v31  ;;  %v459_v33 = vpop.f32.mrb[1].mxu0  ;;  %v223_v30 = vld [vmem:[%s741_s1 + $0x60] sm:$0xff]  ;;  %v224_v31 = vld [vmem:[%s741_s1 + $0x68] sm:$0xff] }
 0x168   :  { %517 = vtanh.f32 %v120_v32  ;;  %v124_v37 = vmax.f32 %v120_v32, 0.0  ;;  %v492_v32 = vpack.c.bf16 %v224_v31, %v223_v30 }
 0x16a   :  { %493 = vmatpush3.bf16.msra.mxu1 %v492_v32 }
 0x16b   :  { %494 = vmatprep.subr.bf16.mxu1 %v540_v3 }
 0x172   :  { %v518_v38 = vpop.eup %517 }
 0x173   :  { %v125_v39 = vsel %vm14_vm1, %v518_v38, %v124_v37  ;;  %v225_v37 = vld [vmem:[%s741_s1 + $0x70] sm:$0xff]  ;;  %v226_v38 = vld [vmem:[%s741_s1 + $0x78] sm:$0xff] }
 0x174   :  { %v131_v40 = vmul.f32 %v130_v36, %v125_v39  ;;  %v495_v39 = vpack.c.bf16 %v226_v38, %v225_v37 }
 0x176   :  { %142 = vrot.lane.b32.xlu0 %v131_v40, %s543_s4  ;;  %v133_v41 = vsel %vm132_vm3, %v131_v40, 0.0  ;;  %496 = vmatpush3.bf16.msra.mxu1 %v495_v39 }
 0x177   :  { %134 = vadd.xlane.f32.xlu1 %v133_v41  ;;  %497 = vmatprep.subr.bf16.mxu1 %v540_v3 }
 0x1e8   :  { %v143_v42 = vpop.permute.xlu0 %142 }
 0x1e9   :  { %v145_v43 = vsel %vm132_vm3, %v143_v42, 0.0  ;;  %v227_v42 = vld [vmem:[%s741_s1 + $0x80] sm:$0xff] }
 0x1ea   :  { %146 = vadd.xlane.f32.xlu1 %v145_v43 }
 0x204   :  { %v135_v46 = vpop.xlane.xlu1 %134 }
 0x205   :  { %v140_v47 = vadd.f32 %v139_v45, %v135_v46  ;;  %v229_v45 = vld [vmem:[%s741_s1 + $0x90] sm:$0xff]  ;;  %v230_v46 = vld [vmem:[%s741_s1 + $0x98] sm:$0xff] }
 0x207   :  { %v154_v48 = vsub.f32 0.0, %v140_v47  ;;  %v501_v47 = vpack.c.bf16 %v230_v46, %v229_v45 }
 0x209   :  { %v155_v49 = vmul.f32 1.442695, %v154_v48  ;;  %v160_v41 = vsel %vm158_vm5, %v154_v48, 0.0  ;;  %v207_v48 = vld [vmem:[%s741_s1 + $0x58] sm:$0x7] }
 0x20b   :  { %519 = vpow2.f32 %v155_v49  ;;  %v220_v49 = vrot.slane %v207_v48, %v129_v34 }
 0x215   :  { %v520_v55 = vpop.eup %519 }
 0x277   :  { %v147_v52 = vpop.xlane.xlu1 %146 }
 0x278   :  { %v152_v53 = vadd.f32 %v151_v51, %v147_v52  ;;  %v211_v51 = vrot.slane %v207_v48, %v606_v20 }
 0x27a   :  { %v153_v54 = vsub.f32 %v567_v1, %v152_v53 }
 0x27c   :  { %v157_v56 = vmul.f32 %v520_v55, %v153_v54 }
 0x27e   :  { %v643_v57 = vsel %vm158_vm5, %v157_v56, %v567_v1  ;;  %v185_v1 = vmul.f32 1.442695, %v624_v35 }
 0x27f   :  { %v163_v58 = vsel %vm162_vm4, %v643_v57, 0.0 }
 0x280   :  { %v164_v59 = vrot.slane %v163_v58, 4  ;;  %521 = vpow2.f32 %v185_v1 }
 0x282   :  { %v165_v60 = vadd.f32 %v164_v59, %v163_v58 }
 0x284   :  { %v166_v61 = vrot.slane %v165_v60, 2 }
 0x286   :  { %v167_v62 = vadd.f32 %v166_v61, %v165_v60  ;;  %v706_v61 = vld [vmem:[%s741_s1 + $0xa8] sm:$0x3f] }
 0x287   :  { %v369_v39 = vmul.f32 1.442695, %v706_v61 }
 0x288   :  { %v168_v63 = vrot.slane %v167_v62, 1 }
 0x28a   :  { %v169_v0 = vadd.f32 %v168_v63, %v167_v62  ;;  %v522_v16 = vpop.eup %521  ;;  %v319_v62 = vrot.slane %v706_v61, %v27_v18  ;;  %v327_v18 = vrot.slane %v706_v61, %v606_v20 }
 0x28b   :  { %v190_v19 = vrot.slane %v522_v16, %v651_v15 }
 0x28c   :  { %v171_v2 = vmul.f32 0.125, %v169_v0 }
 0x28e   :  { %v172_v4 = vsub.f32 %v643_v57, %v171_v2 }
 0x290   :  { %v173_v5 = vmul.f32 %v172_v4, %v172_v4  ;;  %v191_v22 = vmul.f32 %v190_v19, %v172_v4 }
 0x292   :  { %v174_v6 = vsel %vm162_vm4, %v173_v5, 0.0 }
 0x293   :  { %v175_v7 = vrot.slane %v174_v6, 4 }
 0x295   :  { %v176_v8 = vadd.f32 %v175_v7, %v174_v6 }
 0x297   :  { %v177_v9 = vrot.slane %v176_v8, 2 }
 0x299   :  { %v178_v10 = vadd.f32 %v177_v9, %v176_v8 }
 0x29b   :  { %v179_v11 = vrot.slane %v178_v10, 1 }
 0x29d   :  { %v180_v12 = vadd.f32 %v179_v11, %v178_v10 }
 0x29f   :  { %v182_v13 = vmul.f32 0.14285715, %v180_v12  ;;  %v339_v12 = vrot.slane %v706_v61, %v150_v50 }
 0x2a1   :  { %v183_v14 = vadd.f32 1e-05, %v182_v13 }
 0x2a3   :  { %523 = vrsqrt.f32 %v183_v14 }
 0x2a4   :  { %525 = vlog2.f32 %v183_v14 }
 0x2ad   :  { %v524_v24 = vpop.eup %523 }
 0x2ae   :  { %v526_v25 = vpop.eup %525  ;;  %v192_v27 = vmul.f32 %v524_v24, %v191_v22 }
 0x2af   :  { %v199_v28 = vmul.f32 0.6931472, %v526_v25 }
 0x2b0   :  { %v658_v29 = vadd.f32 %v196_v23, %v192_v27 }
 0x2b1   :  { %v200_v33 = vmul.f32 0.5, %v199_v28 }
 0x2b2   :  { %214 = vperm.xlu0 %514, %v658_v29  }
 0x2b3   :  { %v201_v36 = vsub.f32 %v624_v35, %v200_v33  ;;  %v228_v35 = vld [vmem:[%s741_s1 + $0x88] sm:$0xff] }
 0x2b4   :  { %v498_v43 = vpack.c.bf16 %v228_v35, %v227_v42 }
 0x2b5   :  { %v205_v40 = vrot.slane %v201_v36, %v651_v15 }
 0x2b6   :  { %499 = vmatpush3.bf16.msra.mxu1 %v498_v43 }
 0x2b7   :  { %v206_v44 = vadd.f32 %v205_v40, %v160_v41  ;;  %500 = vmatprep.subr.bf16.mxu1 %v540_v3  ;;  %v421_v3 = vld [vmem:[%s741_s1 + $0xa0] ss:$0 sm:$0xff]  ;;  %s546_s1 = smov 4  }
 0x2ba   :  { %502 = vmatpush3.bf16.msra.mxu1 %v501_v47  ;;  %v380_v47 = vrot.slane %v706_v61, %v195_v21 }
 0x331   :  { %v215_v52 = vpop.permute.xlu0 %214 }
 0x332   :  { %v221_v53 = vmul.f32 %v220_v49, %v215_v52 }
 0x334   :  { %v222_v54 = vadd.f32 %v221_v53, %v211_v51 }
 0x336   :  { %527 = vtanh.f32 %v222_v54  ;;  %v233_v55 = vmax.f32 %v222_v54, 0.0 }
 0x340   :  { %v528_v56 = vpop.eup %527 }
 0x341   :  { %v234_v58 = vsel %vm14_vm1, %v528_v56, %v233_v55 }
 0x342   :  { %477 = vmatmul.mubr.msk.f32.vlgmr.msra.gmra.mrb[0].mxu1 %vm49_vm2, %v234_v58 }
 0x415   :  { %v308_v59 = vpop.f32.mrb[0].mxu1 }
 0x416   :  { %v309_v60 = vadd.f32 %v421_v3, %v308_v59  ;;  %v478_v34 = vpop.f32.mrb[1].mxu1 }
 0x418   :  { %529 = vtanh.f32 %v309_v60  ;;  %v313_v63 = vmax.f32 %v309_v60, 0.0 }
 0x422   :  { %v530_v0 = vpop.eup %529 }
 0x423   :  { %v314_v2 = vsel %vm14_vm1, %v530_v0, %v313_v63 }
 0x424   :  { %v320_v4 = vmul.f32 %v319_v62, %v314_v2 }
 0x426   :  { %330 = vrot.lane.b32.xlu1 %v320_v4, %s543_s4  ;;  %v321_v5 = vsel %vm132_vm3, %v320_v4, 0.0 }
 0x427   :  { %322 = vadd.xlane.f32.xlu0 %v321_v5 }
 0x43d   :  { %391 = vrot.lane.b32.xlu0 %v658_v29, %s545_s26 }
 0x498   :  { %v331_v6 = vpop.permute.xlu1 %330 }
 0x499   :  { %v333_v7 = vsel %vm132_vm3, %v331_v6, 0.0 }
 0x49a   :  { %334 = vadd.xlane.f32.xlu1 %v333_v7 }
 0x4b4   :  { %v323_v8 = vpop.xlane.xlu0 %322 }
 0x4b5   :  { %v328_v1 = vadd.f32 %v327_v18, %v323_v8 }
 0x4b7   :  { %v342_v26 = vsub.f32 0.0, %v328_v1 }
 0x4b8   :  { %v392_v3 = vpop.permute.xlu0 %391 }
 0x4b9   :  { %v347_v9 = vsel %vm158_vm5, 0.0, %v342_v26  ;;  %v343_v11 = vmul.f32 1.442695, %v342_v26  ;;  %v406_v21 = vsel %vm162_vm4, %v643_v57, %v392_v3 }
 0x4ba   :  { %v348_v10 = vadd.f32 %v347_v9, %v206_v44 }
 0x4bb   :  { %531 = vpow2.f32 %v343_v11 }
 0x4bc   :  { %533 = vpow2.f32 %v369_v39 }
 0x4c5   :  { %v532_v19 = vpop.eup %531 }
 0x4c6   :  { %v534_v44 = vpop.eup %533 }
 0x4c7   :  { %v374_v45 = vrot.slane %v534_v44, %v651_v15 }
 0x527   :  { %v335_v13 = vpop.xlane.xlu1 %334 }
 0x528   :  { %v340_v14 = vadd.f32 %v339_v12, %v335_v13 }
 0x52a   :  { %v341_v16 = vsub.f32 %v658_v29, %v340_v14 }
 0x52c   :  { %v345_v22 = vmul.f32 %v532_v19, %v341_v16 }
 0x52e   :  { %v346_v20 = vsel %vm158_vm5, %v658_v29, %v345_v22 }
 0x52f   :  { %395 = vrot.lane.b32.xlu1 %v346_v20, %s546_s1  ;;  %v349_v23 = vsel %vm162_vm4, %v346_v20, 0.0 }
 0x530   :  { %v350_v24 = vrot.slane %v349_v23, 4 }
 0x532   :  { %v351_v25 = vadd.f32 %v350_v24, %v349_v23 }
 0x534   :  { %v352_v27 = vrot.slane %v351_v25, 2 }
 0x536   :  { %v353_v28 = vadd.f32 %v352_v27, %v351_v25 }
 0x538   :  { %v354_v30 = vrot.slane %v353_v28, 1 }
 0x53a   :  { %v355_v31 = vadd.f32 %v354_v30, %v353_v28 }
 0x53c   :  { %v356_v50 = vmul.f32 0.125, %v355_v31 }
 0x53e   :  { %v357_v32 = vsub.f32 %v346_v20, %v356_v50 }
 0x540   :  { %v358_v33 = vmul.f32 %v357_v32, %v357_v32  ;;  %v375_v46 = vmul.f32 %v374_v45, %v357_v32 }
 0x542   :  { %v359_v36 = vsel %vm162_vm4, %v358_v33, 0.0 }
 0x543   :  { %v360_v37 = vrot.slane %v359_v36, 4 }
 0x545   :  { %v361_v38 = vadd.f32 %v360_v37, %v359_v36 }
 0x547   :  { %v362_v29 = vrot.slane %v361_v38, 2 }
 0x549   :  { %v363_v40 = vadd.f32 %v362_v29, %v361_v38 }
 0x54b   :  { %v364_v41 = vrot.slane %v363_v40, 1 }
 0x54d   :  { %v365_v42 = vadd.f32 %v364_v41, %v363_v40 }
 0x54f   :  { %v366_v35 = vmul.f32 0.14285715, %v365_v42 }
 0x551   :  { %v367_v43 = vadd.f32 1e-05, %v366_v35 }
 0x553   :  { %535 = vrsqrt.f32 %v367_v43 }
 0x554   :  { %537 = vlog2.f32 %v367_v43 }
 0x55d   :  { %v536_v48 = vpop.eup %535 }
 0x55e   :  { %v538_v49 = vpop.eup %537  ;;  %v376_v51 = vmul.f32 %v536_v48, %v375_v46 }
 0x55f   :  { %v383_v52 = vmul.f32 0.6931472, %v538_v49 }
 0x560   :  { %v381_v53 = vadd.f32 %v380_v47, %v376_v51 }
 0x561   :  { %v384_v54 = vmul.f32 0.5, %v383_v52 }
 0x562   :  { %399 = vrot.lane.b32.xlu0 %v381_v53, %s547_s27 }
 0x563   :  { %v385_v55 = vsub.f32 %v706_v61, %v384_v54 }
 0x565   :  { %v389_v56 = vrot.slane %v385_v55, %v651_v15 }
 0x567   :  { %v390_v58 = vadd.f32 %v389_v56, %v348_v10 }
 0x569   :  { %403 = vrot.lane.b32.xlu0 %v390_v58, %s548_s28 }
 0x5a1   :  { %v396_v17 = vpop.permute.xlu1 %395 }
 0x5a2   :  { %v408_v60 = vsel %vm407_vm6, %v406_v21, %v396_v17 }
 0x5d4   :  { %v400_v59 = vpop.permute.xlu0 %399 }
 0x5d5   :  { %v410_v34 = vsel %vm409_vm7, %v408_v60, %v400_v59 }
 0x5db   :  { %v404_v62 = vpop.permute.xlu0 %403 }
 0x5dc   :  { %v412_v63 = vsel %vm411_vm8, %v410_v34, %v404_v62 }
 0x5dd   :  { %414 = vst.msk [vmem:[%s742_s2] sm:$0xff] %vm413_vm9, %v412_v63 }

</bundles_post_ra>
